<compile_context>
chip_gen: v5e
topology: v5e:2x2
jax: 0.10.0
libtpu: 0.0.40
codegen_flags: <defaults>
</compile_context>

<pallas_src>
import functools

import jax
import jax.numpy as jnp
from jax import lax
from jax.experimental import pallas as pl
from jax.experimental.pallas import tpu as pltpu


_INV_SQRT2 = 0.7071067811865476      # 1/sqrt(2) for exact (erf) GELU
_SQRT_2_OVER_PI = 0.7978845608028654  # sqrt(2/pi) for tanh-approx GELU


def _round_up(a, b):
    return ((a + b - 1) // b) * b


def _bert_linear_kernel(x_ref, w_ref, p_ref, o_ref, acc_ref, *,
                        eps, n_valid, approx_gelu):
    # x_ref:   (tm, tk)      input rows tile (native dtype)
    # w_ref:   (tk, N_pad)   weight K-slab, [in, out] layout (native dtype)
    # p_ref:   (8,  N_pad)   packed f32 params: row 0 = bias, 1 = gamma, 2 = beta
    # o_ref:   (tm, N_pad)   output tile
    # acc_ref: (tm, N_pad)   f32 accumulator scratch (persists across the k axis)
    k = pl.program_id(1)

    @pl.when(k == 0)
    def _():
        acc_ref[...] = jnp.zeros_like(acc_ref)

    # Linear on the MXU: native-dtype operands, f32 accumulation.
    acc_ref[...] += jnp.dot(x_ref[...], w_ref[...], preferred_element_type=jnp.float32)

    @pl.when(k == pl.num_programs(1) - 1)
    def _():
        h = acc_ref[...] + p_ref[0:1, :]                     # + bias

        if approx_gelu:
            # tanh-approx GELU: transcendental runs on the EUP slot.  Slight deviation
            # from torch.nn.GELU()'s exact erf formulation.
            c = jnp.float32(_SQRT_2_OVER_PI)
            h = 0.5 * h * (1.0 + jnp.tanh(c * (h + 0.044715 * h * h * h)))
        else:
            # Exact GELU (erf) -- matches torch.nn.GELU() default.  GELU(0) == 0, so
            # zero-padded feature columns stay exactly zero.
            h = 0.5 * h * (1.0 + lax.erf(h * jnp.float32(_INV_SQRT2)))

        # LayerNorm via sum / sum-of-squares.  Padded columns of h are exactly 0, so the
        # sums over N_pad equal the sums over the valid N columns -> no mask needed, and
        # the two row reductions are independent (no mean -> (h-u) -> sum chain).
        inv_n = jnp.float32(1.0 / n_valid)
        u = jnp.sum(h, axis=-1, keepdims=True) * inv_n
        s = jnp.sum(h * h, axis=-1, keepdims=True) * inv_n - u * u
        s = jnp.maximum(s, 0.0)                              # guard f32 cancellation
        hn = (h - u) * lax.rsqrt(s + jnp.float32(eps))

        # gamma is zero-padded, so padded output columns are exactly 0.
        out = p_ref[1:2, :] * hn + p_ref[2:3, :]
        o_ref[...] = out.astype(o_ref.dtype)


def bert_linear(x, w, b, gamma, beta, *, eps=1e-12, tm=512, approx_gelu=False):
    """x: [..., input_size]; w: [input_size, output_size]; b/gamma/beta: [output_size]."""
    *lead, K = x.shape
    N = w.shape[1]
    M = 1
    for d in lead:
        M *= d
    x2 = x.reshape(M, K)

    x_is = jnp.dtype(x.dtype).itemsize
    w_is = jnp.dtype(w.dtype).itemsize
    o_is = x_is

    # Lane-dense output: pad feature dim to a multiple of 128.
    N_pad = _round_up(N, 128)
    pad_n = N_pad - N

    # --- Generation-aware VMEM budget (v5e/v6e 128 MiB, v7x 64 MiB per TC). ---
    cap = 64 * 1024 * 1024
    try:
        cap = int(getattr(pltpu.get_tpu_info(), "vmem_capacity_bytes", cap))
    except Exception:
        pass
    budget = int(0.70 * cap)        # target working-set size when picking tiles
    vmem_limit = int(0.85 * cap)    # scoped-VMEM limit handed to Mosaic

    # --- Row tile: dtype-aware sublane clamp; keep >= 2 row steps for megacore (v7x). ---
    sub = max(8, 32 // x_is)        # 8 f32 / 16 bf16 / 32 int8-fp8 sublanes
    tm = max(sub, (int(tm) // sub) * sub)
    m_ceil = _round_up(M, sub)
    tm = min(tm, m_ceil)
    if m_ceil > sub:
        half = _round_up((m_ceil + 1) // 2, sub)
        tm = min(tm, max(sub, half))

    # --- K tile: keep the whole weight resident if it fits, else tile K (multiple of 128). ---
    def footprint(tm_, tk_):
        return (2 * tm_ * tk_ * x_is          # x tiles (double-buffered)
                + 2 * tk_ * N_pad * w_is      # weight slabs (double-buffered)
                + 2 * tm_ * N_pad * o_is      # output tiles (double-buffered)
                + tm_ * N_pad * 4             # f32 accumulator scratch
                + 2 * 8 * N_pad * 4           # packed bias/gamma/beta
                + 2 * tm_ * N_pad * 4)        # f32 epilogue intermediates headroom

    def pick_tk(tm_):
        if footprint(tm_, K) <= budget:
            return K                          # single K step, weight fully resident
        for cand in (2048, 1024, 512, 256, 128):
            if cand < K and footprint(tm_, cand) <= budget:
                return cand
        return None

    tk = pick_tk(tm)
    while tk is None and tm > sub:
        tm = max(sub, ((tm // 2) // sub) * sub)
        tk = pick_tk(tm)
    if tk is None:
        tk = min(K, 128)

    if tk == K:
        K_pad = K
    else:
        K_pad = _round_up(K, tk)
    grid_k = K_pad // tk
    pad_k = K_pad - K

    M_pad = _round_up(M, tm)

    if pad_k or pad_n:
        w = jnp.pad(w, ((0, pad_k), (0, pad_n)))
    if (M_pad - M) or pad_k:
        x2 = jnp.pad(x2, ((0, M_pad - M), (0, pad_k)))

    # Pack bias / gamma / beta into one (8, N_pad) f32 array: 1 block, 1 DMA, cast once.
    params = jnp.stack([b, gamma, beta]).astype(jnp.float32)   # (3, N)
    params = jnp.pad(params, ((0, 5), (0, pad_n)))             # (8, N_pad), zeros elsewhere

    # TODO(synk): optionally cast x/w to bf16 here (keep f32 accumulation) when the accuracy
    # budget allows -- halves weight HBM/VMEM bytes and hits the single-pass bf16 MXU path.

    kernel = functools.partial(_bert_linear_kernel, eps=eps, n_valid=N,
                               approx_gelu=approx_gelu)

    out = pl.pallas_call(
        kernel,
        out_shape=jax.ShapeDtypeStruct((M_pad, N_pad), x.dtype),
        grid_spec=pltpu.PrefetchScalarGridSpec(
            num_scalar_prefetch=0,
            grid=(M_pad // tm, grid_k),
            in_specs=[
                pl.BlockSpec((tm, tk), lambda i, k: (i, k)),       # x rows x K-slab
                pl.BlockSpec((tk, N_pad), lambda i, k: (k, 0)),    # weight K-slab
                pl.BlockSpec((8, N_pad), lambda i, k: (0, 0)),     # packed bias/gamma/beta
            ],
            out_specs=pl.BlockSpec((tm, N_pad), lambda i, k: (i, 0)),
            scratch_shapes=[pltpu.VMEM((tm, N_pad), jnp.float32)],
        ),
        compiler_params=pltpu.CompilerParams(
            dimension_semantics=("parallel", "arbitrary"),
            vmem_limit_bytes=vmem_limit,
        ),
    )(x2, w, params)

    return out[:M, :N].reshape(*lead, N)


if __name__ == "__main__":
    # Small shapes consistent with the module: batch=2, seq=8, input=32, output=32.
    batch, seq, input_size, output_size = 2, 8, 32, 32

    key = jax.random.PRNGKey(0)
    kx, kw = jax.random.split(key)

    x = jax.random.normal(kx, (batch, seq, input_size), dtype=jnp.float32)

    # Deterministic param init mirroring the module's __init__:
    #   linear.weight ~ N(0, 0.02), linear.bias = 0, LN weight = 1, LN bias = 0
    w_torch_layout = 0.02 * jax.random.normal(kw, (output_size, input_size), dtype=jnp.float32)
    w = w_torch_layout.T                      # stored as [input_size, output_size]
    b = jnp.zeros((output_size,), jnp.float32)
    gamma = jnp.ones((output_size,), jnp.float32)
    beta = jnp.zeros((output_size,), jnp.float32)

    # TODO(synk): dropout is identity at p=0.0 (module default), so it is omitted.
    out = bert_linear(x, w, b, gamma, beta)
    jax.block_until_ready(out)

    # Reference check in plain JAX (exact GELU + Bert-style LayerNorm with exact variance).
    h = x.reshape(-1, input_size) @ w + b
    h = 0.5 * h * (1.0 + lax.erf(h / jnp.sqrt(2.0)))
    u = h.mean(-1, keepdims=True)
    s = ((h - u) ** 2).mean(-1, keepdims=True)
    ref = (gamma * (h - u) / jnp.sqrt(s + 1e-12) + beta).reshape(batch, seq, output_size)
    assert jnp.allclose(out, ref, atol=1e-5, rtol=1e-5), "mismatch vs reference"

    print("KERNEL_OK")
</pallas_src>

<mosaic_0001>
module attributes {stable_mosaic.version = 11 : i64} {
  func.func @_bert_linear_kernel(%arg0: i32, %arg1: i32, %arg2: memref<8x32xf32, #tpu.memory_space<vmem>>, %arg3: memref<32x128xf32, #tpu.memory_space<vmem>>, %arg4: memref<8x128xf32, #tpu.memory_space<vmem>>, %arg5: memref<8x128xf32, #tpu.memory_space<vmem>>, %arg6: memref<8x128xf32, #tpu.memory_space<vmem>>) attributes {dimension_semantics = [#tpu.dimension_semantics<parallel>, #tpu.dimension_semantics<arbitrary>], iteration_bounds = array<i64: 2, 1>, scalar_prefetch = 0 : i64, scratch_operands = 1 : i64, tpu.core_type = #tpu.core_type<tc>, window_params = [{transform_indices = @transform_0, window_bounds = array<i64: 8, 32>}, {transform_indices = @transform_1, window_bounds = array<i64: 32, 128>}, {pipeline_mode = #tpu.pipeline_mode<synchronous>, transform_indices = @transform_2, window_bounds = array<i64: 8, 128>}, {transform_indices = @transform_3, window_bounds = array<i64: 8, 128>}]} {
    %c0_i32 = arith.constant 0 : i32
    %0 = arith.cmpi eq, %arg1, %c0_i32 : i32
    %1 = arith.extui %0 : i1 to i32
    %c0_i32_0 = arith.constant 0 : i32
    %2 = arith.cmpi ne, %1, %c0_i32_0 : i32
    scf.if %2 {
      %cst_10 = arith.constant 0.000000e+00 : f32
      %12 = vector.broadcast %cst_10 : f32 to vector<8x128xf32>
      %c0_11 = arith.constant 0 : index
      %c0_12 = arith.constant 0 : index
      %13 = vector.load %arg6[%c0_11, %c0_12] : memref<8x128xf32, #tpu.memory_space<vmem>>, vector<8x128xf32>
      tpu.vector_store %arg6[%c0_11, %c0_12], %12 {strides = array<i32>} : memref<8x128xf32, #tpu.memory_space<vmem>>, vector<8x128xf32>,
    } else {
    }
    %c0 = arith.constant 0 : index
    %c0_1 = arith.constant 0 : index
    %3 = vector.load %arg6[%c0, %c0_1] : memref<8x128xf32, #tpu.memory_space<vmem>>, vector<8x128xf32>
    %c0_2 = arith.constant 0 : index
    %c0_3 = arith.constant 0 : index
    %4 = vector.load %arg2[%c0_2, %c0_3] : memref<8x32xf32, #tpu.memory_space<vmem>>, vector<8x32xf32>
    %c0_4 = arith.constant 0 : index
    %c0_5 = arith.constant 0 : index
    %5 = vector.load %arg3[%c0_4, %c0_5] : memref<32x128xf32, #tpu.memory_space<vmem>>, vector<32x128xf32>
    %cst = arith.constant dense<0.000000e+00> : vector<8x128xf32>
    %6 = tpu.matmul %4, %5, %cst {dimension_numbers = #tpu.dot_dimension_numbers<[1], [0], [0], [1], [0, 0, 1, 1], [], []>} : vector<8x32xf32>, vector<32x128xf32>, vector<8x128xf32> -> vector<8x128xf32>
    %7 = arith.addf %3, %6 : vector<8x128xf32>
    %c0_6 = arith.constant 0 : index
    %c0_7 = arith.constant 0 : index
    %8 = vector.load %arg6[%c0_6, %c0_7] : memref<8x128xf32, #tpu.memory_space<vmem>>, vector<8x128xf32>
    tpu.vector_store %arg6[%c0_6, %c0_7], %7 {strides = array<i32>} : memref<8x128xf32, #tpu.memory_space<vmem>>, vector<8x128xf32>,
    %c0_i32_8 = arith.constant 0 : i32
    %9 = arith.cmpi eq, %arg1, %c0_i32_8 : i32
    %10 = arith.extui %9 : i1 to i32
    %c0_i32_9 = arith.constant 0 : i32
    %11 = arith.cmpi ne, %10, %c0_i32_9 : i32
    scf.if %11 {
      %c0_10 = arith.constant 0 : index
      %c0_11 = arith.constant 0 : index
      %12 = vector.load %arg6[%c0_10, %c0_11] : memref<8x128xf32, #tpu.memory_space<vmem>>, vector<8x128xf32>
      %c0_12 = arith.constant 0 : index
      %c0_13 = arith.constant 0 : index
      %13 = vector.load %arg4[%c0_12, %c0_13] : memref<8x128xf32, #tpu.memory_space<vmem>>, vector<1x128xf32>
      %14 = vector.broadcast %13 : vector<1x128xf32> to vector<8x128xf32>
      %15 = arith.addf %12, %14 : vector<8x128xf32>
      %cst_14 = arith.constant 5.000000e-01 : f32
      %16 = vector.broadcast %cst_14 : f32 to vector<8x128xf32>
      %17 = arith.mulf %16, %15 : vector<8x128xf32>
      %cst_15 = arith.constant 0.707106769 : f32
      %18 = vector.broadcast %cst_15 : f32 to vector<8x128xf32>
      %19 = arith.mulf %15, %18 : vector<8x128xf32>
      %20 = math.erf %19 : vector<8x128xf32>
      %cst_16 = arith.constant 1.000000e+00 : f32
      %21 = vector.broadcast %cst_16 : f32 to vector<8x128xf32>
      %22 = arith.addf %21, %20 : vector<8x128xf32>
      %23 = arith.mulf %17, %22 : vector<8x128xf32>
      %cst_17 = arith.constant dense<0.000000e+00> : vector<8xf32>
      %24 = vector.multi_reduction <add>, %23, %cst_17 [1] : vector<8x128xf32> to vector<8xf32>
      %25 = vector.shape_cast %24 : vector<8xf32> to vector<8x1xf32>
      %cst_18 = arith.constant 3.125000e-02 : f32
      %26 = vector.broadcast %cst_18 : f32 to vector<8x1xf32>
      %27 = arith.mulf %25, %26 : vector<8x1xf32>
      %28 = arith.mulf %23, %23 : vector<8x128xf32>
      %cst_19 = arith.constant dense<0.000000e+00> : vector<8xf32>
      %29 = vector.multi_reduction <add>, %28, %cst_19 [1] : vector<8x128xf32> to vector<8xf32>
      %30 = vector.shape_cast %29 : vector<8xf32> to vector<8x1xf32>
      %cst_20 = arith.constant 3.125000e-02 : f32
      %31 = vector.broadcast %cst_20 : f32 to vector<8x1xf32>
      %32 = arith.mulf %30, %31 : vector<8x1xf32>
      %33 = arith.mulf %27, %27 : vector<8x1xf32>
      %34 = arith.subf %32, %33 : vector<8x1xf32>
      %cst_21 = arith.constant 0.000000e+00 : f32
      %35 = vector.broadcast %cst_21 : f32 to vector<8x1xf32>
      %36 = arith.maximumf %34, %35 : vector<8x1xf32>
      %37 = vector.broadcast %27 : vector<8x1xf32> to vector<8x128xf32>
      %38 = arith.subf %23, %37 : vector<8x128xf32>
      %cst_22 = arith.constant 9.99999996E-13 : f32
      %39 = vector.broadcast %cst_22 : f32 to vector<8x1xf32>
      %40 = arith.addf %36, %39 : vector<8x1xf32>
      %41 = math.rsqrt %40 : vector<8x1xf32>
      %42 = vector.broadcast %41 : vector<8x1xf32> to vector<8x128xf32>
      %43 = arith.mulf %38, %42 : vector<8x128xf32>
      %c1 = arith.constant 1 : index
      %c0_23 = arith.constant 0 : index
      %44 = vector.load %arg4[%c1, %c0_23] : memref<8x128xf32, #tpu.memory_space<vmem>>, vector<1x128xf32>
      %45 = vector.broadcast %44 : vector<1x128xf32> to vector<8x128xf32>
      %46 = arith.mulf %45, %43 : vector<8x128xf32>
      %c2 = arith.constant 2 : index
      %c0_24 = arith.constant 0 : index
      %47 = vector.load %arg4[%c2, %c0_24] : memref<8x128xf32, #tpu.memory_space<vmem>>, vector<1x128xf32>
      %48 = vector.broadcast %47 : vector<1x128xf32> to vector<8x128xf32>
      %49 = arith.addf %46, %48 : vector<8x128xf32>
      %c0_25 = arith.constant 0 : index
      %c0_26 = arith.constant 0 : index
      %50 = vector.load %arg5[%c0_25, %c0_26] : memref<8x128xf32, #tpu.memory_space<vmem>>, vector<8x128xf32>
      tpu.vector_store %arg5[%c0_25, %c0_26], %49 {strides = array<i32>} : memref<8x128xf32, #tpu.memory_space<vmem>>, vector<8x128xf32>,
    } else {
    }
    return
  }
  func.func @transform_0(%arg0: i32, %arg1: i32) -> (i32, i32) {
    %c0_i32 = arith.constant 0 : i32
    return %arg0, %arg1 : i32, i32
  }
  func.func @transform_1(%arg0: i32, %arg1: i32) -> (i32, i32) {
    %c0_i32 = arith.constant 0 : i32
    %c0_i32_0 = arith.constant 0 : i32
    return %arg1, %c0_i32 : i32, i32
  }
  func.func @transform_2(%arg0: i32, %arg1: i32) -> (i32, i32) {
    %c0_i32 = arith.constant 0 : i32
    %c0_i32_0 = arith.constant 0 : i32
    %c0_i32_1 = arith.constant 0 : i32
    return %c0_i32, %c0_i32_0 : i32, i32
  }
  func.func @transform_3(%arg0: i32, %arg1: i32) -> (i32, i32) {
    %c0_i32 = arith.constant 0 : i32
    %c0_i32_0 = arith.constant 0 : i32
    return %arg0, %c0_i32 : i32, i32
  }
}

</mosaic_0001>

<bundles_post_ra>
// kernel: tpu_custom_call.1
= control target key start
LH: loop header
LB: loop body
LE: loop exit
PB: predicated region body
PF: predicated region fallthrough
CT: control target
= control target key end

     0   :  { %8 = vsyncpa [#allocation4], 0  ;;  %s938_s0 = inlined_call_operand.hbm [shape: f32[16,32], index: 0, kind: input, shape index: {}]   ;;  %s939_s1 = inlined_call_operand.hbm [shape: f32[32,128], index: 1, kind: input, shape index: {}]   ;;  %s940_s2 = inlined_call_operand.hbm [shape: f32[8,128], index: 2, kind: input, shape index: {}]   ;;  %s941_s3 = inlined_call_operand.hbm [shape: f32[16,128], index: 3, kind: output, shape index: {}]  }
   0x1   :  { %10 = vsyncpa [#allocation4 + $0x1], 0 }
   0x2   :  { %11 = vsyncpa [#allocation7], 0 }
   0x3   :  { %12 = vsyncpa [#allocation5], 0 }
   0x4   :  { %14 = vsyncpa [#allocation5 + $0x1], 0  ;;  %s790_s12 = smov 0   ;;  %s792_s13 = smov 0  }
   0x5   :  { %s794_s14 = smov 0   ;;  %s796_s15 = smov 0  }
   0x6   :  { %s798_s16 = smov 0   ;;  %s800_s17 = smov 0  }
   0x7 LB: > { %s477_s18 = sadd.s32 4294967295, %s764_s17   ;;  %p479_p0 = scmp.ge.s32.totalorder %s764_s17, 1  ;;  %s764_s17 = sphi %s800_s17, %s20_s17   ;;  %s760_s16 = sphi %s798_s16, %s951_s16   ;;  %s756_s15 = sphi %s796_s15, %s950_s15   ;;  %s752_s14 = sphi %s794_s14, %s949_s14   ;;  %s748_s13 = sphi %s792_s13, %s948_s13   ;;  %s744_s12 = sphi %s790_s12, %s947_s12  }
   0x8   : > { %p824_p1 = scmp.eq.s32.totalorder %s477_s18, 0  ;;  %p138_p2 = scmp.lt.s32.totalorder %s764_s17, 3 }
   0x9   : > { %s152_s22 = sshll.u32 %s939_s1, 4  ;;  %s766_s24 = smov [#allocation6]   ;;  %s153_s22 = int_to_ptr.hbm [resolvable:$true] %s152_s22 }
   0xa   : > { %p832_p3 = pnand %p479_p0, %p138_p2  ;;  %s154_s25 = sshll.u32 %s766_s24, 4  ;;  %s155_s25 = int_to_ptr.vmem [resolvable:$true] %s154_s25 }
   0xb   : > { %p482_p6 = scmp.ge.s32.totalorder %s764_s17, 2  ;;  %s167_s28 = sshll.u32 %s940_s2, 4  ;;  %s168_s28 = int_to_ptr.hbm [resolvable:$true] %s167_s28 }
   0xc   : > { %p508_p4 = pneg %p832_p3  ;;  %s767_s29 = smov 128  }
   0xd   : > { %s768_s30 = smov 8   ;;  %s769_s4 = smov [#allocation8]  }
   0xe   : > { %p509_p5 = pnand %p508_p4, %p824_p1  ;;  %s169_s5 = sshll.u32 %s769_s4, 4  ;;  %s170_s5 = int_to_ptr.vmem [resolvable:$true] %s169_s5 }
   0xf   : > { %s32_s6 = sadd.s32 1, %s760_s16  ;;  %s478_s7 = sadd.s32 4294967294, %s764_s17  }
  0x10   : > { %511 = dma.hbm_to_vmem [thread:$0]  (!%p509_p5), %s153_s22, 512, %s155_s25, [#allocation7], %s767_s29, %s767_s29, %s768_s30  }
  0x11   : > { %514 = dma.hbm_to_vmem [thread:$0]  (!%p509_p5), %s168_s28, 128, %s170_s5, [#allocation7]  }
  0x12   : > { %p34_p7 = scmp.ge.s32.totalorder %s32_s6, 2  ;;  %s41_s8 = sadd.s32 1, %s752_s14 }
  0x13   : > { %p48_p8 = scmp.ne.s32.totalorder %s752_s14, %s748_s13  ;;  %p49_p9 = scmp.eq.s32.totalorder %s764_s17, 0 }
  0x14   : > { %s953_s6 = smov (%p34_p7, %s32_s6), 0  ;;  %p54_p10 = scmp.ne.s32.totalorder %s748_s13, %s744_s12 }
  0x15   : > { %s36_s9 = ssub.s32 %s760_s16, %s953_s6  ;;  %p125_p11 = scmp.eq.s32.totalorder %s477_s18, 1 }
  0x16   : > { %p39_p12 = scmp.eq.s32.totalorder %s36_s9, 0  ;;  %p860_p13 = por %p824_p1, %p54_p10 }
  0x17   : > { %p864_p0 = por %p125_p11, %p48_p8  ;;  %p131_p2 = scmp.eq.s32.totalorder %s478_s7, 1 }
  0x18   : > { %s869_s20 = scalar_select %p39_p12, %s752_s14, %s41_s8  }
  0x19   : > { %p50_p4 = por %p49_p9, %p48_p8  ;;  %p871_p5 = por %p131_p2, %p54_p10 }
  0x1a   : > { %s180_s22 = sand.u32 1, %s752_s14   ;;  %s484_s18 = sshll.u32 %s760_s16, 3 }
  0x1b   : > { %p525_p7 = scmp.lt.s32.totalorder %s764_s17, 2  ;;  %s483_s24 = sshll.u32 %s180_s22, 3 }
  0x1c   : > { %s189_s27 = scalar_lea.hbm %s938_s0, %s484_s18  ;;  %s184_s29 = scalar_lea.vmem [#allocation3], %s483_s24 }
  0x1d   : > { %s191_s28 = sshll.u32 %s189_s27, 4  ;;  %s193_s30 = sshll.u32 %s184_s29, 4  ;;  %s192_s28 = int_to_ptr.hbm [resolvable:$true] %s191_s28  ;;  %s194_s30 = int_to_ptr.vmem [resolvable:$true] %s193_s30 }
  0x1e   : > { %p516_p11 = pnand %p525_p7, %p50_p4  ;;  %s181_s4 = scalar_lea.sflag [#allocation4], %s180_s22 }
  0x1f   : > { %202 = sbr.rel (%p832_p3) target bundleno = 385 (0x181), region = 32  ;;  %s884_s5 = sand.u32 (!%p832_p3), 1, %s748_s13  }
  0x20   : > { %518 = dma.hbm_to_vmem [thread:$0]  (!%p516_p11), %s192_s28, 128, %s194_s30, %s181_s4  }
  0x21   : > { %s486_s7 = sshll.u32 (!%p832_p3), %s884_s5, 3  ;;  %s205_s8 = scalar_lea.sflag (!%p832_p3), [#allocation4], %s884_s5 }
  0x22   : > { %s208_s9 = scalar_lea.vmem (!%p832_p3), [#allocation3], %s486_s7 }
  0x24   : > { %731 = dma.done.wait (%p860_p13), %s205_s8, 128  }
  0x25   : > { %733 = vsyncadd (%p860_p13), %s205_s8, 4294967168 }
  0x26   : > { %735 = dma.done.wait (%p824_p1), [#allocation7], 640  }
  0x27   : > { %737 = vsyncadd (%p824_p1), [#allocation7], 4294966656  ;;  %v253_v0 = vld [vmem:[#allocation6 + $0x18] sm:$0xff]  ;;  %v252_v1 = vld [vmem:[#allocation6 + $0x10] sm:$0xff]  ;;  %vm254_vm0 = vcmask 261120   ;;  %s493_s19 = sshll.u32 %s756_s15, 3 }
  0x28   : > { %270 = vmatpush.msra.mxu0 %v253_v0  ;;  %v251_v2 = vld [vmem:[#allocation6 + $0x8] sm:$0xff]  ;;  %v250_v3 = vld [vmem:[#allocation6] sm:$0xff]  ;;  %v249_v4 = vld [vmem:[%s208_s9] sm:$0xff]  ;;  %s372_s22 = scalar_lea.hbm %s941_s3, %s493_s19  ;;  %s241_s18 = scalar_lea.vmem [#allocation9], %s486_s7 }
  0x29   : > { %v581_v5 = vld [vmem:[#allocation8] ss:$0 sm:$0xff]  ;;  %v582_v63 = vld [vmem:[#allocation8 + $0x1] ss:$0 sm:$0xff]  ;;  %s374_s24 = sshll.u32 %s241_s18, 4  ;;  %s376_s25 = sshll.u32 %s372_s22, 4  ;;  %s375_s24 = int_to_ptr.vmem [resolvable:$true] %s374_s24  ;;  %s377_s25 = int_to_ptr.hbm [resolvable:$true] %s376_s25 }
  0x2a   : > { %271 = vmatpush.msra.mxu0 %v252_v1  ;;  %s362_s15 = scalar_lea.sflag [#allocation5], %s884_s5  ;;  %s692_s26 = sshra.s32 %s377_s25, 4  ;;  %s693_s26 = int_to_ptr.hbm [resolvable:$true] %s692_s26 }
  0x2b   : > { %s694_s27 = scalar_lea.hbm %s693_s26, 8  ;;  %s698_s30 = scalar_lea.hbm %s941_s3, 16 }
  0x2c   : > { %272 = vmatpush.msra.mxu0 %v251_v2  ;;  %v583_v2 = vld [vmem:[#allocation8 + $0x2] ss:$0 sm:$0xff]  ;;  %p695_p1 = scmp.ne.s32.totalorder %s693_s26, %s694_s27  ;;  %p699_p9 = scmp.lt.s32.totalorder %s693_s26, %s941_s3 }
  0x2d   : > { %p700_p10 = scmp.lt.s32.totalorder %s698_s30, %s694_s27 }
  0x2e   : > { %273 = vmatpush.msra.mxu0 %v250_v3  ;;  %p696_p3 = pnand %p695_p1, %p864_p0 }
  0x2f   : > { %490 = vmatmul.msk.f32.vlgmr.msra.gmra.mxu0 %vm254_vm0, %v249_v4  ;;  %p701_p12 = por %p700_p10, %p699_p9 }
  0x30   : > { %p697_p8 = pneg %p696_p3 }
  0x32   : > { %p702_p13 = pnand %p701_p12, %p697_p8 }
  0xac   : > { %v275_v6 = vpop.f32.mrf.mxu0 }
  0xad   : > { %v286_v7 = vadd.f32 %v581_v5, %v275_v6 }
  0xaf   : > { %v288_v8 = vmul.f32 0.70710677, %v286_v7  ;;  %v287_v44 = vmul.f32 0.5, %v286_v7 }
  0xb1   : > { %v289_v9 = vmul.f32 %v288_v8, %v288_v8 }
  0xb3   : > { %v290_v10 = vmin.f32 %v289_v9, 16.0 }
  0xb5   : > { %v291_v11 = vmul.f32 2.1237322e-06, %v290_v10  ;;  %v302_v12 = vmul.f32 3.8918573e-05, %v290_v10 }
  0xb7   : > { %v292_v13 = vadd.f32 0.00028619796, %v291_v11  ;;  %v303_v14 = vadd.f32 0.001143296, %v302_v12 }
  0xb9   : > { %v293_v15 = vmul.f32 %v292_v13, %v290_v10  ;;  %v304_v16 = vmul.f32 %v303_v14, %v290_v10 }
  0xbb   : > { %v305_v17 = vadd.f32 0.014752088, %v304_v16  ;;  %v294_v18 = vadd.f32 0.0036580483, %v293_v15 }
  0xbd   : > { %v306_v19 = vmul.f32 %v305_v17, %v290_v10  ;;  %v295_v21 = vmul.f32 %v294_v18, %v290_v10 }
  0xbf   : > { %v307_v20 = vadd.f32 0.112945676, %v306_v19  ;;  %v296_v24 = vadd.f32 0.05243302, %v295_v21 }
  0xc1   : > { %v308_v22 = vmul.f32 %v307_v20, %v290_v10  ;;  %v297_v27 = vmul.f32 %v296_v24, %v290_v10 }
  0xc3   : > { %v309_v23 = vadd.f32 0.4994258, %v308_v22  ;;  %v298_v28 = vadd.f32 0.18741608, %v297_v27 }
  0xc5   : > { %v310_v25 = vmul.f32 %v309_v23, %v290_v10  ;;  %v299_v30 = vmul.f32 %v298_v28, %v290_v10 }
  0xc7   : > { %v311_v26 = vadd.f32 1.0, %v310_v25  ;;  %v300_v34 = vadd.f32 1.1283791, %v299_v30 }
  0xc9   : > { %584 = vrcp.f32 %v311_v26  ;;  %v323_v33 = vand.u32 2147483648, %v311_v26  ;;  %v321_v36 = vand.u32 2147483647, %v311_v26  ;;  %vm317_vm2 = vweird.f32 %v311_v26 }
  0xca   : > { %v301_v39 = vmul.f32 %v300_v34, %v288_v8 }
  0xcb   : > { %v324_v38 = vor.u32 1.1754944e-38, %v323_v33  ;;  %vm322_vm4 = vcmp.eq.f32.partialorder %v321_v36, 8.507059e+37 }
  0xcf   : > { %v585_v29 = vpop.eup %584 }
  0xd0   : > { %v313_v31 = vmul.f32 %v585_v29, %v311_v26  ;;  %vm318_vm1 = vweird.f32 %v585_v29 }
  0xd1   : > { %vm319_vm3 = vmor %vm317_vm2, %vm318_vm1 }
  0xd2   : > { %v314_v32 = vsub.f32 1.0, %v313_v31 }
  0xd4   : > { %v315_v35 = vmul.f32 %v585_v29, %v314_v32 }
  0xd6   : > { %v316_v37 = vadd.f32 %v585_v29, %v315_v35 }
  0xd8   : > { %v320_v40 = vsel %vm319_vm3, %v585_v29, %v316_v37 }
  0xd9   : > { %v325_v41 = vsel %vm322_vm4, %v324_v38, %v320_v40 }
  0xda   : > { %v326_v42 = vmul.f32 %v325_v41, %v301_v39 }
  0xdc   : > { %v491_v43 = vclamps-f32 %v326_v42, 1.0 }
  0xde   : > { %v329_v45 = vadd.f32 1.0, %v491_v43 }
  0xe0   : > { %v330_v46 = vmul.f32 %v329_v45, %v287_v44 }
  0xe2   : > { %331 = vadd.xlane.f32.xlu0 %v330_v46  ;;  %v334_v47 = vmul.f32 %v330_v46, %v330_v46 }
  0xea   : > { %335 = vadd.xlane.f32.xlu0 %v334_v47 }
 0x155   : > { %v332_v48 = vpop.xlane.xlu0 %331 }
 0x156   : > { %v333_v49 = vmul.f32 0.03125, %v332_v48 }
 0x158   : > { %v338_v51 = vmul.f32 %v333_v49, %v333_v49  ;;  %v341_v62 = vsub.f32 %v330_v46, %v333_v49 }
 0x15d   : > { %v336_v50 = vpop.xlane.xlu0 %335 }
 0x15e   : > { %v337_v52 = vmul.f32 0.03125, %v336_v50 }
 0x160   : > { %v339_v53 = vsub.f32 %v337_v52, %v338_v51 }
 0x162   : > { %v340_v54 = vmax.f32 %v339_v53, 0.0 }
 0x164   : > { %v342_v55 = vadd.f32 1e-12, %v340_v54 }
 0x166   : > { %586 = vrsqrt.f32 %v342_v55  ;;  %vm349_vm6 = vweird.f32 %v342_v55 }
 0x16c   : > { %v587_v56 = vpop.eup %586 }
 0x16d   : > { %v344_v57 = vmul.f32 %v587_v56, %v342_v55  ;;  %vm350_vm5 = vweird.f32 %v587_v56 }
 0x16e   : > { %vm351_vm7 = vmor %vm349_vm6, %vm350_vm5 }
 0x16f   : > { %v345_v58 = vmul.f32 %v587_v56, %v344_v57 }
 0x171   : > { %v346_v59 = vmul.f32 0.5, %v345_v58 }
 0x173   : > { %v347_v60 = vsub.f32 1.5, %v346_v59 }
 0x175   : > { %v348_v61 = vmul.f32 %v587_v56, %v347_v60 }
 0x177   : > { %v352_v0 = vsel %vm351_vm7, %v587_v56, %v348_v61 }
 0x178   : > { %v353_v1 = vmul.f32 %v352_v0, %v341_v62 }
 0x17a   : > { %v356_v3 = vmul.f32 %v582_v63, %v353_v1 }
 0x17c   : > { %v359_v4 = vadd.f32 %v583_v2, %v356_v3 }
 0x17e   : > { %360 = vst [vmem:[%s241_s18] sm:$0xff] %v359_v4 }
 0x17f   : > { %705 = shalt.err (!%p702_p13)
}
 0x180   : > { %506 = dma.vmem_to_hbm [thread:$0]  (%p864_p0), %s375_s24, 128, %s377_s25, %s362_s15  }
 0x181 PF: > { %s388_s5 = sand.u32 1, %s744_s12   ;;  %p520_p2 = pnand %p482_p6, %p871_p5 }
 0x182   : > { %s389_s8 = scalar_lea.sflag [#allocation5], %s388_s5 }
 0x183   : > { %p521_p4 = pneg %p520_p2 }
 0x185   : > { %739 = dma.done.wait (%p521_p4), %s389_s8, 128  }
 0x186   : > { %741 = vsyncadd (%p521_p4), %s389_s8, 4294967168  ;;  %s20_s17 = sadd.s32 1, %s764_s17   ;;  %s947_s12 = smov %s748_s13 }
 0x187   : > { %p17_p7 = scmp.ge.s32.totalorder %s20_s17, 4   ;;  %s948_s13 = smov %s752_s14 }
 0x188   : > { %s949_s14 = smov %s869_s20  ;;  %s950_s15 = smov %s760_s16 }
 0x189   : > { %s951_s16 = smov %s953_s6  ;;  %19 = sbr.rel (!%p17_p7) target bundleno = 7 (0x7), region = 94 }
 0x18e   :  { %395 = vsyncpa [#allocation4], 1 }
 0x18f   :  { %397 = vsyncpa [#allocation4 + $0x1], 1 }
 0x190   :  { %398 = vsyncpa [#allocation7], 1 }
 0x191   :  { %399 = vsyncpa [#allocation5], 1 }
 0x192   :  { %401 = vsyncpa [#allocation5 + $0x1], 1 }

</bundles_post_ra>
